<compile_context>
chip_gen: v7x
topology: tpu7x:2x2x1
jax: 0.10.0
libtpu: 0.0.40
codegen_flags: <defaults>
</compile_context>

<pallas_src>
import jax
import jax.numpy as jnp
from jax.experimental import pallas as pl
from jax.experimental.pallas import tpu as pltpu

HIDDEN = 1024  # fixed by the module definition
LANE = 128
SUBLANE = 8


def _round_up(x, m):
    return (x + m - 1) // m * m


def _mlp_kernel(x_ref, w1_ref, b1_ref, w2_ref, b2_ref, o_ref):
    # fc1: (tm, d_in) @ (d_in, HIDDEN) on the MXU, f32 accumulation.
    h = jnp.dot(x_ref[...], w1_ref[...], preferred_element_type=jnp.float32)
    # bias + ReLU on the VPU in f32.
    h = jnp.maximum(h + b1_ref[...], 0.0)
    # Feed fc2 in the weights' dtype (bf16) -> native MXU width, halves the
    # (tm, HIDDEN) VMEM temporary between the two matmuls.
    h = h.astype(w2_ref.dtype)
    # fc2: (tm, HIDDEN) @ (HIDDEN, d_out_p), f32 accumulation + bias.
    out = jnp.dot(h, w2_ref[...], preferred_element_type=jnp.float32)
    o_ref[...] = (out + b2_ref[...]).astype(o_ref.dtype)


def _resident_spec(shape):
    """BlockSpec for a grid-invariant operand, single-buffered if supported."""
    index_map = lambda i: (0, 0)
    buffered = getattr(pl, "Buffered", None)
    if buffered is not None:
        try:
            return pl.BlockSpec(shape, index_map, pipeline_mode=buffered(1))
        except TypeError:  # older API without pipeline_mode
            pass
    return pl.BlockSpec(shape, index_map)


def prepare_params(w1, b1, w2, b2, *, use_bf16=True):
    """One-time parameter prep: cast to the MXU dtype and pad d_out to a
    lane-dense multiple of 128. Do this ONCE and reuse across forward calls."""
    d_in, hidden = w1.shape
    assert hidden == HIDDEN and w2.shape == (HIDDEN, w2.shape[1])
    d_out = w2.shape[1]
    d_out_p = _round_up(max(d_out, LANE), LANE)
    wdt = jnp.bfloat16 if use_bf16 else jnp.float32

    w1_p = w1.astype(wdt)                                   # (d_in, HIDDEN), no padding
    b1_2d = b1.reshape(1, HIDDEN).astype(jnp.float32)
    w2_p = jnp.zeros((HIDDEN, d_out_p), wdt).at[:, :d_out].set(w2.astype(wdt))
    b2_2d = jnp.zeros((1, d_out_p), jnp.float32).at[0, :d_out].set(
        b2.astype(jnp.float32))

    return {
        "w1": w1_p, "b1": b1_2d, "w2": w2_p, "b2": b2_2d,
        "d_in": int(d_in), "d_out": int(d_out), "d_out_p": int(d_out_p),
        "use_bf16": bool(use_bf16),
    }


def encoding_decoding_forward(x, params, *, tm=None, out_dtype=jnp.float32):
    """Fused forward pass: relu(x @ w1 + b1) @ w2 + b2.

    x      : (B, d_in) float32 (or bf16)
    params : dict from prepare_params (pre-cast / pre-padded weights)
    Returns (B, d_out) in out_dtype.
    """
    w1_p, b1_2d, w2_p, b2_2d = params["w1"], params["b1"], params["w2"], params["b2"]
    d_in, d_out, d_out_p = params["d_in"], params["d_out"], params["d_out_p"]
    use_bf16 = params["use_bf16"]

    B = x.shape[0]
    assert x.shape[1] == d_in

    in_dtype = jnp.bfloat16 if use_bf16 else jnp.float32
    row_align = 16 if use_bf16 else SUBLANE  # bf16 packs 16 rows per vreg

    # ---- batch tiling -------------------------------------------------------
    # Pad B only to the row-alignment multiple, then pick the number of tiles
    # first (target tile 512 rows) and derive tm via cdiv. This bounds batch
    # over-padding and naturally yields >=2 grid steps on large batches so a
    # v7x dual-TensorCore chip can shard the ("parallel",) axis.
    B_min = _round_up(max(B, row_align), row_align)
    target_tm = 512 if tm is None else max(row_align, _round_up(tm, row_align))
    n_tiles = max(1, pl.cdiv(B_min, target_tm))
    tm_eff = _round_up(pl.cdiv(B_min, n_tiles), row_align)
    B_p = n_tiles * tm_eff

    # Per-call input prep: only row padding + dtype cast (no column padding).
    # Padded rows produce garbage (relu(b1)@W2 + b2) but are sliced away below.
    if B_p != B or x.dtype != in_dtype:
        x_p = jnp.zeros((B_p, d_in), in_dtype).at[:B, :].set(x.astype(in_dtype))
    else:
        x_p = x

    # ---- VMEM budget (weights single-buffered, x/out double-buffered) -------
    wbytes = 2 if use_bf16 else 4
    out_bytes = jnp.dtype(out_dtype).itemsize
    need = (
        2 * tm_eff * d_in * wbytes          # x tiles (double-buffered)
        + 1 * d_in * HIDDEN * wbytes        # W1 (resident, single-buffered)
        + 1 * HIDDEN * 4                    # b1
        + 1 * HIDDEN * d_out_p * wbytes     # W2 (resident, single-buffered)
        + 1 * d_out_p * 4                   # b2
        + 2 * tm_eff * d_out_p * out_bytes  # out tiles (double-buffered)
        + tm_eff * HIDDEN * (4 + wbytes)    # h in f32 + MXU-dtype copy for fc2
    )
    # Keep the scoped limit modest (v7x has 64 MiB physical / 32 MiB default),
    # but never below what the kernel actually needs.
    vmem_limit = int(min(max(need + (2 << 20), 16 << 20), 64 << 20))

    grid = (B_p // tm_eff,)
    out_p = pl.pallas_call(
        _mlp_kernel,
        out_shape=jax.ShapeDtypeStruct((B_p, d_out_p), out_dtype),
        grid_spec=pltpu.PrefetchScalarGridSpec(
            num_scalar_prefetch=0,
            grid=grid,
            in_specs=[
                pl.BlockSpec((tm_eff, d_in), lambda i: (i, 0)),  # x tile over batch
                _resident_spec((d_in, HIDDEN)),                  # W1 (resident)
                _resident_spec((1, HIDDEN)),                     # b1
                _resident_spec((HIDDEN, d_out_p)),               # W2 (resident)
                _resident_spec((1, d_out_p)),                    # b2
            ],
            out_specs=pl.BlockSpec((tm_eff, d_out_p), lambda i: (i, 0)),
        ),
        compiler_params=pltpu.CompilerParams(
            dimension_semantics=("parallel",),
            vmem_limit_bytes=vmem_limit,
        ),
    )(x_p, w1_p, b1_2d, w2_p, b2_2d)

    return out_p[:B, :d_out]


def reference_forward(x, w1, b1, w2, b2, *, use_bf16=True):
    """Pure-JAX reference matching the kernel's precision choices."""
    if use_bf16:
        xd = x.astype(jnp.bfloat16)
        w1d = w1.astype(jnp.bfloat16)
        w2d = w2.astype(jnp.bfloat16)
    else:
        xd, w1d, w2d = x, w1, w2
    h = jnp.dot(xd, w1d, preferred_element_type=jnp.float32) + b1
    h = jnp.maximum(h, 0.0)
    if use_bf16:
        h = h.astype(jnp.bfloat16)
    return jnp.dot(h, w2d, preferred_element_type=jnp.float32) + b2


if __name__ == "__main__":
    # Small shapes consistent with the module: input_size=32, output_size=16.
    B, D_IN, D_OUT = 16, 32, 16

    key = jax.random.PRNGKey(0)
    kx, k1, k2, k3, k4 = jax.random.split(key, 5)

    # Deterministic parameter init (PyTorch-Linear-style uniform bounds).
    bound1 = 1.0 / jnp.sqrt(D_IN)
    bound2 = 1.0 / jnp.sqrt(HIDDEN)
    x = jax.random.normal(kx, (B, D_IN), dtype=jnp.float32)
    w1 = jax.random.uniform(k1, (D_IN, HIDDEN), jnp.float32, -bound1, bound1)
    b1 = jax.random.uniform(k2, (HIDDEN,), jnp.float32, -bound1, bound1)
    w2 = jax.random.uniform(k3, (HIDDEN, D_OUT), jnp.float32, -bound2, bound2)
    b2 = jax.random.uniform(k4, (D_OUT,), jnp.float32, -bound2, bound2)

    # One-time parameter prep (hoisted out of the per-call path).
    params = prepare_params(w1, b1, w2, b2, use_bf16=True)

    # Case 1: aligned batch.
    out = jax.block_until_ready(encoding_decoding_forward(x, params))
    assert out.shape == (B, D_OUT)
    ref_bf16 = reference_forward(x, w1, b1, w2, b2, use_bf16=True)
    ref_f32 = reference_forward(x, w1, b1, w2, b2, use_bf16=False)
    assert jnp.allclose(out, ref_bf16, atol=2e-3, rtol=2e-3), "mismatch vs bf16 reference"
    assert jnp.allclose(out, ref_f32, atol=5e-2, rtol=5e-2), "mismatch vs f32 reference"

    # Case 2: batch not a multiple of the sublane/tile (exercises padding path).
    B2 = 13
    x2 = jax.random.normal(jax.random.PRNGKey(1), (B2, D_IN), dtype=jnp.float32)
    out2 = jax.block_until_ready(encoding_decoding_forward(x2, params))
    ref2 = reference_forward(x2, w1, b1, w2, b2, use_bf16=True)
    assert out2.shape == (B2, D_OUT)
    assert jnp.allclose(out2, ref2, atol=2e-3, rtol=2e-3), "mismatch on ragged batch"

    # Case 3: larger batch that produces multiple grid steps (tiling path).
    B3 = 1030
    x3 = jax.random.normal(jax.random.PRNGKey(2), (B3, D_IN), dtype=jnp.float32)
    out3 = jax.block_until_ready(encoding_decoding_forward(x3, params))
    ref3 = reference_forward(x3, w1, b1, w2, b2, use_bf16=True)
    assert out3.shape == (B3, D_OUT)
    assert jnp.allclose(out3, ref3, atol=2e-3, rtol=2e-3), "mismatch on multi-tile batch"

    print("KERNEL_OK")
</pallas_src>

<mosaic_0001>
module attributes {stable_mosaic.version = 11 : i64} {
  func.func @_mlp_kernel(%arg0: i32, %arg1: memref<16x32xbf16, #tpu.memory_space<vmem>>, %arg2: memref<32x1024xbf16, #tpu.memory_space<vmem>>, %arg3: memref<1x1024xf32, #tpu.memory_space<vmem>>, %arg4: memref<1024x128xbf16, #tpu.memory_space<vmem>>, %arg5: memref<1x128xf32, #tpu.memory_space<vmem>>, %arg6: memref<16x128xf32, #tpu.memory_space<vmem>>) attributes {dimension_semantics = [#tpu.dimension_semantics<parallel>], iteration_bounds = array<i64: 1>, scalar_prefetch = 0 : i64, scratch_operands = 0 : i64, tpu.core_type = #tpu.core_type<tc>, window_params = [{transform_indices = @transform_0, window_bounds = array<i64: 16, 32>}, {pipeline_mode = #tpu.pipeline_mode<synchronous>, transform_indices = @transform_1, window_bounds = array<i64: 32, 1024>}, {pipeline_mode = #tpu.pipeline_mode<synchronous>, transform_indices = @transform_2, window_bounds = array<i64: 1, 1024>}, {pipeline_mode = #tpu.pipeline_mode<synchronous>, transform_indices = @transform_3, window_bounds = array<i64: 1024, 128>}, {pipeline_mode = #tpu.pipeline_mode<synchronous>, transform_indices = @transform_4, window_bounds = array<i64: 1, 128>}, {transform_indices = @transform_5, window_bounds = array<i64: 16, 128>}]} {
    %c0 = arith.constant 0 : index
    %c0_0 = arith.constant 0 : index
    %0 = vector.load %arg1[%c0, %c0_0] : memref<16x32xbf16, #tpu.memory_space<vmem>>, vector<16x32xbf16>
    %c0_1 = arith.constant 0 : index
    %c0_2 = arith.constant 0 : index
    %1 = vector.load %arg2[%c0_1, %c0_2] : memref<32x1024xbf16, #tpu.memory_space<vmem>>, vector<32x1024xbf16>
    %cst = arith.constant dense<0.000000e+00> : vector<16x1024xf32>
    %2 = tpu.matmul %0, %1, %cst {dimension_numbers = #tpu.dot_dimension_numbers<[1], [0], [0], [1], [0, 0, 1, 1], [], []>} : vector<16x32xbf16>, vector<32x1024xbf16>, vector<16x1024xf32> -> vector<16x1024xf32>
    %c0_3 = arith.constant 0 : index
    %c0_4 = arith.constant 0 : index
    %3 = vector.load %arg3[%c0_3, %c0_4] : memref<1x1024xf32, #tpu.memory_space<vmem>>, vector<1x1024xf32>
    %4 = vector.broadcast %3 : vector<1x1024xf32> to vector<16x1024xf32>
    %5 = arith.addf %2, %4 : vector<16x1024xf32>
    %cst_5 = arith.constant 0.000000e+00 : f32
    %6 = vector.broadcast %cst_5 : f32 to vector<16x1024xf32>
    %7 = arith.maximumf %5, %6 : vector<16x1024xf32>
    %8 = arith.truncf %7 : vector<16x1024xf32> to vector<16x1024xbf16>
    %c0_6 = arith.constant 0 : index
    %c0_7 = arith.constant 0 : index
    %9 = vector.load %arg4[%c0_6, %c0_7] : memref<1024x128xbf16, #tpu.memory_space<vmem>>, vector<1024x128xbf16>
    %cst_8 = arith.constant dense<0.000000e+00> : vector<16x128xf32>
    %10 = tpu.matmul %8, %9, %cst_8 {dimension_numbers = #tpu.dot_dimension_numbers<[1], [0], [0], [1], [0, 0, 1, 1], [], []>} : vector<16x1024xbf16>, vector<1024x128xbf16>, vector<16x128xf32> -> vector<16x128xf32>
    %c0_9 = arith.constant 0 : index
    %c0_10 = arith.constant 0 : index
    %11 = vector.load %arg5[%c0_9, %c0_10] : memref<1x128xf32, #tpu.memory_space<vmem>>, vector<1x128xf32>
    %12 = vector.broadcast %11 : vector<1x128xf32> to vector<16x128xf32>
    %13 = arith.addf %10, %12 : vector<16x128xf32>
    %c0_11 = arith.constant 0 : index
    %c0_12 = arith.constant 0 : index
    %14 = vector.load %arg6[%c0_11, %c0_12] : memref<16x128xf32, #tpu.memory_space<vmem>>, vector<16x128xf32>
    tpu.vector_store %arg6[%c0_11, %c0_12], %13 {strides = array<i32>} : memref<16x128xf32, #tpu.memory_space<vmem>>, vector<16x128xf32>,
    return
  }
  func.func @transform_0(%arg0: i32) -> (i32, i32) {
    %c0_i32 = arith.constant 0 : i32
    %c0_i32_0 = arith.constant 0 : i32
    return %arg0, %c0_i32 : i32, i32
  }
  func.func @transform_1(%arg0: i32) -> (i32, i32) {
    %c0_i32 = arith.constant 0 : i32
    %c0_i32_0 = arith.constant 0 : i32
    %c0_i32_1 = arith.constant 0 : i32
    return %c0_i32, %c0_i32_0 : i32, i32
  }
  func.func @transform_2(%arg0: i32) -> (i32, i32) {
    %c0_i32 = arith.constant 0 : i32
    %c0_i32_0 = arith.constant 0 : i32
    %c0_i32_1 = arith.constant 0 : i32
    return %c0_i32, %c0_i32_0 : i32, i32
  }
  func.func @transform_3(%arg0: i32) -> (i32, i32) {
    %c0_i32 = arith.constant 0 : i32
    %c0_i32_0 = arith.constant 0 : i32
    %c0_i32_1 = arith.constant 0 : i32
    return %c0_i32, %c0_i32_0 : i32, i32
  }
  func.func @transform_4(%arg0: i32) -> (i32, i32) {
    %c0_i32 = arith.constant 0 : i32
    %c0_i32_0 = arith.constant 0 : i32
    %c0_i32_1 = arith.constant 0 : i32
    return %c0_i32, %c0_i32_0 : i32, i32
  }
  func.func @transform_5(%arg0: i32) -> (i32, i32) {
    %c0_i32 = arith.constant 0 : i32
    %c0_i32_0 = arith.constant 0 : i32
    return %arg0, %c0_i32 : i32, i32
  }
}

</mosaic_0001>

<bundles_post_ra>
// kernel: tpu_custom_call.1
= control target key start
LH: loop header
LB: loop body
LE: loop exit
PB: predicated region body
PF: predicated region fallthrough
CT: control target
= control target key end

     0   :  { %10 = vsyncpa [#allocation3], 0  ;;  %s1615_s0 = inlined_call_operand.hbm [shape: bf16[16,32], index: 0, kind: input, shape index: {}]   ;;  %s1616_s1 = inlined_call_operand.hbm [shape: bf16[32,1024], index: 1, kind: input, shape index: {}]   ;;  %s1617_s2 = inlined_call_operand.hbm [shape: f32[1,1024], index: 2, kind: input, shape index: {}]   ;;  %s1618_s3 = inlined_call_operand.hbm [shape: bf16[1024,128], index: 3, kind: input, shape index: {}]   ;;  %s1619_s4 = inlined_call_operand.vmem [shape: f32[1,128], index: 4, kind: input, shape index: {}]   ;;  %s1620_s5 = inlined_call_operand.hbm [shape: f32[16,128], index: 5, kind: output, shape index: {}]  }
   0x1   :  { %11 = vsyncpa [#allocation6], 0 }
   0x2   :  { %12 = vsyncpa [#allocation9], 0 }
   0x3   :  { %13 = vsyncpa [#allocation4], 0  ;;  %s1493_s18 = smov [#allocation5]   ;;  %s1375_s22 = scalar_lea.hbm %s1616_s1, 2048 }
   0x4   :  { %s31_s19 = sshll.u32 %s1493_s18, 4  ;;  %p1376_p0 = scmp.ne.s32.totalorder %s1616_s1, %s1375_s22  ;;  %s32_s19 = int_to_ptr.vmem [resolvable:$true] %s31_s19 }
   0x5   :  { %p1379_p1 = scmp.lt.u32.totalorder %s1375_s22, %s1616_s1 }
   0x7   :  { %p1381_p2 = pnand %p1379_p1, %p1376_p0 }
   0x9   :  { %1384 = shalt.err (!%p1381_p2)
}
   0xa   :  { %s1385_s27 = scalar_lea.vmem %s32_s19, 2048  ;;  %p1390_p4 = scmp.lt.s32.totalorder %s32_s19, %s32_s19 }
   0xb   :  { %p1386_p3 = scmp.ne.s32.totalorder %s32_s19, %s1385_s27  ;;  %p1391_p5 = scmp.lt.s32.totalorder %s1385_s27, %s1385_s27 }
   0xd   :  { %p1392_p6 = por %p1391_p5, %p1390_p4 }
   0xf   :  { %p1393_p7 = pnand %p1392_p6, %p1386_p3 }
  0x11   :  { %1396 = shalt.err (!%p1393_p7)
}
  0x12   :  { %s1494_s28 = smov 512   ;;  %s1495_s29 = smov 32  }
  0x13   :  { %37 = dma.hbm_to_vmem [thread:$0]  %s1616_s1, 2048, %s32_s19, [#allocation6], %s1494_s28, %s1494_s28, %s1495_s29  }
  0x14   :  { %s1496_s7 = smov [#allocation2]   ;;  %s1397_s11 = scalar_lea.hbm %s1615_s0, 128 }
  0x15   :  { %s19_s8 = sshll.u32 %s1496_s7, 4  ;;  %p1398_p8 = scmp.ne.s32.totalorder %s1615_s0, %s1397_s11  ;;  %s20_s8 = int_to_ptr.vmem [resolvable:$true] %s19_s8 }
  0x16   :  { %p1401_p9 = scmp.lt.u32.totalorder %s1397_s11, %s1615_s0 }
  0x18   :  { %p1403_p10 = pnand %p1401_p9, %p1398_p8 }
  0x1a   :  { %1406 = shalt.err (!%p1403_p10)
}
  0x1b   :  { %s1407_s16 = scalar_lea.vmem %s20_s8, 128  ;;  %p1412_p12 = scmp.lt.s32.totalorder %s20_s8, %s20_s8 }
  0x1c   :  { %p1408_p11 = scmp.ne.s32.totalorder %s20_s8, %s1407_s16  ;;  %p1413_p13 = scmp.lt.s32.totalorder %s1407_s16, %s1407_s16 }
  0x1e   :  { %p1414_p0 = por %p1413_p13, %p1412_p12 }
  0x20   :  { %p1415_p1 = pnand %p1414_p0, %p1408_p11 }
  0x22   :  { %1418 = shalt.err (!%p1415_p1)
}
  0x23   :  { %s1497_s1 = smov 64   ;;  %s1498_s17 = smov 4  }
  0x24   :  { %25 = dma.hbm_to_vmem [thread:$0]  %s1615_s0, 128, %s20_s8, [#allocation3], %s1497_s1, %s1497_s1, %s1498_s17  }
  0x25   :  { %s1499_s20 = smov [#allocation7]   ;;  %s1500_s22 = smov [#allocation8]  }
  0x26   :  { %s44_s21 = sshll.u32 %s1499_s20, 4  ;;  %s53_s23 = sshll.u32 %s1500_s22, 4  ;;  %s45_s21 = int_to_ptr.vmem [resolvable:$true] %s44_s21  ;;  %s1562_s23 = int_to_ptr.vmem [resolvable:$true] %s53_s23 }
  0x27   :  { %s1419_s26 = scalar_lea.hbm %s1617_s2, 128 }
  0x28   :  { %p1420_p2 = scmp.ne.s32.totalorder %s1617_s2, %s1419_s26  ;;  %p1423_p3 = scmp.lt.u32.totalorder %s1419_s26, %s1617_s2 }
  0x2a   :  { %p1425_p4 = pnand %p1423_p3, %p1420_p2 }
  0x2c   :  { %1428 = shalt.err (!%p1425_p4)
}
  0x2d   :  { %s1429_s0 = scalar_lea.vmem %s45_s21, 128  ;;  %p1434_p6 = scmp.lt.s32.totalorder %s45_s21, %s45_s21 }
  0x2e   :  { %p1430_p5 = scmp.ne.s32.totalorder %s45_s21, %s1429_s0  ;;  %p1435_p7 = scmp.lt.s32.totalorder %s1429_s0, %s1429_s0 }
  0x30   :  { %p1436_p8 = por %p1435_p7, %p1434_p6 }
  0x32   :  { %p1437_p9 = pnand %p1436_p8, %p1430_p5 }
  0x34   :  { %1440 = shalt.err (!%p1437_p9)
}
  0x35   :  { %47 = dma.hbm_to_vmem [thread:$0]  %s1617_s2, 128, %s45_s21, [#allocation6]  }
  0x36   :  { %s1441_s10 = scalar_lea.hbm %s1618_s3, 8192 }
  0x37   :  { %p1442_p10 = scmp.ne.s32.totalorder %s1618_s3, %s1441_s10  ;;  %p1445_p11 = scmp.lt.u32.totalorder %s1441_s10, %s1618_s3 }
  0x39   :  { %p1447_p12 = pnand %p1445_p11, %p1442_p10 }
  0x3b   :  { %1450 = shalt.err (!%p1447_p12)
}
  0x3c   :  { %s1451_s15 = scalar_lea.vmem %s1562_s23, 8192  ;;  %p1456_p0 = scmp.lt.s32.totalorder %s1562_s23, %s1562_s23 }
  0x3d   :  { %p1452_p13 = scmp.ne.s32.totalorder %s1562_s23, %s1451_s15  ;;  %p1457_p1 = scmp.lt.s32.totalorder %s1451_s15, %s1451_s15 }
  0x3f   :  { %p1458_p2 = por %p1457_p1, %p1456_p0 }
  0x41   :  { %p1459_p3 = pnand %p1458_p2, %p1452_p13 }
  0x43   :  { %1462 = shalt.err (!%p1459_p3)
}
  0x44   :  { %59 = dma.hbm_to_vmem [thread:$0]  %s1618_s3, 8192, %s1562_s23, [#allocation9], %s1497_s1, %s1497_s1, %s1498_s17  }
  0x45   :  { %1485 = dma.done.wait [#allocation3], 128  }
  0x46   :  { %1486 = vsyncadd [#allocation3], 4294967168 }
  0x47   :  { %1487 = dma.done.wait [#allocation6], 2176  }
  0x48   :  { %1488 = vsyncadd [#allocation6], 4294965120 }
  0x49   :  { %1489 = dma.done.wait [#allocation9], 8192  }
  0x4a   :  { %1490 = vsyncadd [#allocation9], 4294959104  ;;  %v1501_v0 = vmov 0   ;;  %v77_v1 = vld [vmem:[#allocation5] sm:$0xff]  ;;  %v78_v3 = vld [vmem:[#allocation5 + $0x8] sm:$0xff]  ;;  %vm220_vm0 = vcmask 261120  }
  0x4b   :  { %256 = vmatprep.mubr.bf16.mxu0 %v1501_v0  ;;  %299 = vmatprep.mubr.bf16.mxu1 %v1501_v0  ;;  %v81_v2 = vld [vmem:[#allocation5 + $0x20] sm:$0xff]  ;;  %v82_v5 = vld [vmem:[#allocation5 + $0x28] sm:$0xff]  ;;  %v79_v15 = vld [vmem:[#allocation5 + $0x10] sm:$0xff] }
  0x4c   :  { %v1126_v4 = vcombine.high %v77_v1, %v81_v2  ;;  %v1125_v6 = vcombine.low %v77_v1, %v81_v2  ;;  %v85_v7 = vld [vmem:[#allocation5 + $0x40] sm:$0xff]  ;;  %v1128_v9 = vcombine.high %v78_v3, %v82_v5  ;;  %v1127_v10 = vcombine.low %v78_v3, %v82_v5  ;;  %v86_v12 = vld [vmem:[#allocation5 + $0x48] sm:$0xff]  ;;  %v83_v17 = vld [vmem:[#allocation5 + $0x30] sm:$0xff] }
  0x4d   :  { %v89_v8 = vld [vmem:[#allocation5 + $0x60] sm:$0xff]  ;;  %v90_v13 = vld [vmem:[#allocation5 + $0x68] sm:$0xff]  ;;  %v80_v18 = vld [vmem:[#allocation5 + $0x18] sm:$0xff]  ;;  %v1130_v22 = vcombine.high %v79_v15, %v83_v17  ;;  %v1129_v28 = vcombine.low %v79_v15, %v83_v17 }
  0x4e   :  { %v1134_v11 = vcombine.high %v85_v7, %v89_v8  ;;  %224 = vmatprep.subr.bf16.mxu0 %v1126_v4  ;;  %v1136_v14 = vcombine.high %v86_v12, %v90_v13  ;;  %267 = vmatprep.subr.bf16.mxu1 %v1128_v9  ;;  %v1133_v16 = vcombine.low %v85_v7, %v89_v8  ;;  %v84_v19 = vld [vmem:[#allocation5 + $0x38] sm:$0xff]  ;;  %v87_v23 = vld [vmem:[#allocation5 + $0x50] sm:$0xff]  ;;  %v1311_v34 = vld [vmem:[#allocation8 + $0x40] sm:$0xff]   ;;  %v95_v4 = vlaneseq }
  0x4f   :  { %225 = vmatpush1.bf16.msra.mxu0 %v1125_v6  ;;  %268 = vmatpush1.bf16.msra.mxu1 %v1127_v10  ;;  %v1135_v20 = vcombine.low %v86_v12, %v90_v13  ;;  %v1310_v21 = vld [vmem:[#allocation2] sm:$0xff]   ;;  %v91_v24 = vld [vmem:[#allocation5 + $0x70] sm:$0xff]  ;;  %v1132_v25 = vcombine.high %v80_v18, %v84_v19  ;;  %v1131_v29 = vcombine.low %v80_v18, %v84_v19  ;;  %v1312_v35 = vld [vmem:[#allocation8 + $0xc0] sm:$0xff]  }
  0x50   :  { %226 = vmatprep.subr.bf16.mxu0 %v1134_v11  ;;  %269 = vmatprep.subr.bf16.mxu1 %v1136_v14  ;;  %v88_v26 = vld [vmem:[#allocation5 + $0x58] sm:$0xff]  ;;  %v1138_v30 = vcombine.high %v87_v23, %v91_v24  ;;  %v1137_v32 = vcombine.low %v87_v23, %v91_v24  ;;  %v1313_v36 = vld [vmem:[#allocation8] sm:$0xff]   ;;  %v1315_v38 = vld [vmem:[#allocation8 + $0x48] sm:$0xff]   ;;  %v96_v5 = vshrl.u32 %v95_v4, 7 }
  0x51   :  { %v92_v27 = vld [vmem:[#allocation5 + $0x78] sm:$0xff]  ;;  %v1314_v37 = vld [vmem:[#allocation8 + $0x80] sm:$0xff]   ;;  %v1316_v39 = vld [vmem:[#allocation8 + $0xc8] sm:$0xff]  }
  0x52   :  { %v1140_v31 = vcombine.high %v88_v26, %v92_v27  ;;  %v1139_v33 = vcombine.low %v88_v26, %v92_v27  ;;  %v1317_v40 = vld [vmem:[#allocation8 + $0x8] sm:$0xff]   ;;  %v1319_v42 = vld [vmem:[#allocation8 + $0x50] sm:$0xff]   ;;  %v1323_v46 = vld [vmem:[#allocation8 + $0x58] sm:$0xff]   ;;  %v97_v6 = vsub.s32 0, %v96_v5  ;;  %v105_v8 = vsub.s32 2, %v96_v5 }
  0x53   :  { %227 = vmatpush1.bf16.msra.mxu0 %v1133_v16  ;;  %270 = vmatpush1.bf16.msra.mxu1 %v1135_v20  ;;  %v1318_v41 = vld [vmem:[#allocation8 + $0x88] sm:$0xff]   ;;  %v1320_v43 = vld [vmem:[#allocation8 + $0xd0] sm:$0xff]   ;;  %v1324_v47 = vld [vmem:[#allocation8 + $0xd8] sm:$0xff]   ;;  %v101_v9 = vsub.s32 1, %v96_v5  ;;  %v109_v10 = vsub.s32 3, %v96_v5  ;;  %v113_v15 = vsub.s32 4, %v96_v5 }
  0x54   :  { %310 = vmatprep.subr.bf16.mxu0 %v1130_v22  ;;  %353 = vmatprep.subr.bf16.mxu1 %v1132_v25  ;;  %v1321_v44 = vld [vmem:[#allocation8 + $0x10] sm:$0xff]   ;;  %v1325_v48 = vld [vmem:[#allocation8 + $0x18] sm:$0xff]   ;;  %v1327_v50 = vld [vmem:[#allocation8 + $0x60] sm:$0xff]   ;;  %v117_v17 = vsub.s32 5, %v96_v5  ;;  %v121_v25 = vsub.s32 6, %v96_v5 }
  0x55   :  { %v1322_v45 = vld [vmem:[#allocation8 + $0x90] sm:$0xff]   ;;  %v1326_v49 = vld [vmem:[#allocation8 + $0x98] sm:$0xff]   ;;  %v1328_v51 = vld [vmem:[#allocation8 + $0xe0] sm:$0xff]  }
  0x56   :  { %1141 = vmatmul.mubr.msk.bf16.vlgmr.msra.gmra.mrb[0].mxu0 %vm220_vm0, %v1310_v21  ;;  %1142 = vmatmul.mubr.msk.bf16.vlgmr.msra.gmra.mrb[0].mxu1 %vm220_vm0, %v1310_v21  ;;  %v1329_v52 = vld [vmem:[#allocation8 + $0x20] sm:$0xff]   ;;  %v1331_v54 = vld [vmem:[#allocation8 + $0x68] sm:$0xff]   ;;  %v1335_v58 = vld [vmem:[#allocation8 + $0x70] sm:$0xff]  }
  0x57   :  { %311 = vmatpush1.bf16.msra.mxu0 %v1129_v28  ;;  %354 = vmatpush1.bf16.msra.mxu1 %v1131_v29  ;;  %v1330_v53 = vld [vmem:[#allocation8 + $0xa0] sm:$0xff]   ;;  %v1332_v55 = vld [vmem:[#allocation8 + $0xe8] sm:$0xff]   ;;  %v1336_v59 = vld [vmem:[#allocation8 + $0xf0] sm:$0xff]  }
  0x58   :  { %312 = vmatprep.subr.bf16.mxu0 %v1138_v30  ;;  %355 = vmatprep.subr.bf16.mxu1 %v1140_v31  ;;  %v1333_v56 = vld [vmem:[#allocation8 + $0x28] sm:$0xff]   ;;  %v1337_v60 = vld [vmem:[#allocation8 + $0x30] sm:$0xff]   ;;  %v1339_v62 = vld [vmem:[#allocation8 + $0x78] sm:$0xff]   ;;  %v125_v31 = vsub.s32 7, %v96_v5 }
  0x59   :  { %342 = vmatprep.mubr.bf16.mxu0 %v1501_v0  ;;  %385 = vmatprep.mubr.bf16.mxu1 %v1501_v0  ;;  %v1334_v57 = vld [vmem:[#allocation8 + $0xa8] sm:$0xff]   ;;  %v1338_v61 = vld [vmem:[#allocation8 + $0xb0] sm:$0xff]   ;;  %v1340_v63 = vld [vmem:[#allocation8 + $0xf8] sm:$0xff]  }
  0x5a   :  { %v1341_v0 = vld [vmem:[#allocation8 + $0x38] sm:$0xff]   ;;  %v1343_v2 = vld [vmem:[#allocation8 + $0x140] sm:$0xff]   ;;  %v1349_v4 = vld [vmem:[#allocation8 + $0x108] sm:$0xff]  }
  0x5b   :  { %313 = vmatpush1.bf16.msra.mxu0 %v1137_v32  ;;  %356 = vmatpush1.bf16.msra.mxu1 %v1139_v33  ;;  %v1342_v1 = vld [vmem:[#allocation8 + $0xb8] sm:$0xff]   ;;  %v1344_v3 = vld [vmem:[#allocation8 + $0x1c0] sm:$0xff]  }
  0x5c   :  { %1210 = vmatprep.subr.bf16.mxu0 %v1311_v34  ;;  %1232 = vmatprep.subr.bf16.mxu1 %v1312_v35  ;;  %v93_v7 = vld [vmem:[#allocation7] sm:$0xff] }
  0x5d   :  { %v98_v11 = vrot.slane %v93_v7, %v97_v6  ;;  %v106_v12 = vrot.slane %v93_v7, %v105_v8  ;;  %v102_v13 = vrot.slane %v93_v7, %v101_v9  ;;  %v110_v14 = vrot.slane %v93_v7, %v109_v10  ;;  %v1350_v10 = vld [vmem:[#allocation8 + $0x188] sm:$0xff]  }
  0x5e   :  { %1143 = vmatmul.mubr.msk.bf16.vlgmr.msra.gmra.mrb[4].mxu0 %vm220_vm0, %v1310_v21  ;;  %1144 = vmatmul.mubr.msk.bf16.vlgmr.msra.gmra.mrb[4].mxu1 %vm220_vm0, %v1310_v21  ;;  %v114_v30 = vrot.slane %v93_v7, %v113_v15  ;;  %v1352_v15 = vld [vmem:[#allocation8 + $0x1d0] sm:$0xff]  }
  0x5f   :  { %1211 = vmatpush3.bf16.msra.mxu0 %v1313_v36  ;;  %1233 = vmatpush3.bf16.msra.mxu1 %v1314_v37  ;;  %v118_v36 = vrot.slane %v93_v7, %v117_v17 }
  0x60   :  { %1212 = vmatprep.subr.bf16.mxu0 %v1315_v38  ;;  %1234 = vmatprep.subr.bf16.mxu1 %v1316_v39 }
  0x63   :  { %1213 = vmatpush3.bf16.msra.mxu0 %v1317_v40  ;;  %1235 = vmatpush3.bf16.msra.mxu1 %v1318_v41 }
  0x64   :  { %1214 = vmatprep.subr.bf16.mxu0 %v1319_v42  ;;  %1236 = vmatprep.subr.bf16.mxu1 %v1320_v43 }
  0x67   :  { %1215 = vmatpush3.bf16.msra.mxu0 %v1321_v44  ;;  %1237 = vmatpush3.bf16.msra.mxu1 %v1322_v45  ;;  %v122_v44 = vrot.slane %v93_v7, %v121_v25 }
  0x68   :  { %1216 = vmatprep.subr.bf16.mxu0 %v1323_v46  ;;  %1238 = vmatprep.subr.bf16.mxu1 %v1324_v47  ;;  %v126_v47 = vrot.slane %v93_v7, %v125_v31  ;;  %v1361_v31 = vld [vmem:[#allocation8 + $0x120] sm:$0xff]  }
  0x6b   :  { %1217 = vmatpush3.bf16.msra.mxu0 %v1325_v48  ;;  %1239 = vmatpush3.bf16.msra.mxu1 %v1326_v49 }
  0x6c   :  { %1218 = vmatprep.subr.bf16.mxu0 %v1327_v50  ;;  %1240 = vmatprep.subr.bf16.mxu1 %v1328_v51  ;;  %v1345_v50 = vld [vmem:[#allocation8 + $0x100] sm:$0xff]  }
  0x6f   :  { %1219 = vmatpush3.bf16.msra.mxu0 %v1329_v52  ;;  %1241 = vmatpush3.bf16.msra.mxu1 %v1330_v53  ;;  %v1346_v53 = vld [vmem:[#allocation8 + $0x180] sm:$0xff]  }
  0x70   :  { %1220 = vmatprep.subr.bf16.mxu0 %v1331_v54  ;;  %1242 = vmatprep.subr.bf16.mxu1 %v1332_v55  ;;  %v1347_v54 = vld [vmem:[#allocation8 + $0x148] sm:$0xff]  }
  0x73   :  { %1221 = vmatpush3.bf16.msra.mxu0 %v1333_v56  ;;  %1243 = vmatpush3.bf16.msra.mxu1 %v1334_v57 }
  0x74   :  { %1222 = vmatprep.subr.bf16.mxu0 %v1335_v58  ;;  %1244 = vmatprep.subr.bf16.mxu1 %v1336_v59  ;;  %v1348_v58 = vld [vmem:[#allocation8 + $0x1c8] sm:$0xff]  }
  0x77   :  { %1223 = vmatpush3.bf16.msra.mxu0 %v1337_v60  ;;  %1245 = vmatpush3.bf16.msra.mxu1 %v1338_v61 }
  0x78   :  { %1224 = vmatprep.subr.bf16.mxu0 %v1339_v62  ;;  %1246 = vmatprep.subr.bf16.mxu1 %v1340_v63 }
  0x7b   :  { %1225 = vmatpush3.bf16.msra.mxu0 %v1341_v0  ;;  %1247 = vmatpush3.bf16.msra.mxu1 %v1342_v1 }
  0x7c   :  { %1254 = vmatprep.subr.bf16.mxu0 %v1343_v2  ;;  %1276 = vmatprep.subr.bf16.mxu1 %v1344_v3 }
 0x129   :  { %v258_v16 = vpop.f32.mrb[0].mxu0  ;;  %v301_v19 = vpop.f32.mrb[0].mxu1 }
 0x12a   :  { %v259_v18 = vadd.f32 %v258_v16, %v98_v11  ;;  %v260_v20 = vpop.f32.mrb[1].mxu0  ;;  %v302_v21 = vadd.f32 %v301_v19, %v106_v12  ;;  %v303_v23 = vpop.f32.mrb[1].mxu1 }
 0x12b   :  { %v261_v22 = vadd.f32 %v260_v20, %v102_v13  ;;  %v262_v24 = vpop.f32.mrb[2].mxu0  ;;  %v304_v26 = vadd.f32 %v303_v23, %v110_v14  ;;  %v305_v28 = vpop.f32.mrb[2].mxu1  ;;  %v1353_v20 = vld [vmem:[#allocation8 + $0x110] sm:$0xff]  }
 0x12c   :  { %v263_v27 = vadd.f32 %v262_v24, %v98_v11  ;;  %v264_v29 = vpop.f32.mrb[3].mxu0  ;;  %v398_v32 = vmax.f32 %v302_v21, 0.0  ;;  %v306_v33 = vadd.f32 %v305_v28, %v106_v12  ;;  %v307_v35 = vpop.f32.mrb[3].mxu1  ;;  %v396_v37 = vmax.f32 %v259_v18, 0.0  ;;  %v1351_v11 = vld [vmem:[#allocation8 + $0x150] sm:$0xff]   ;;  %v1355_v24 = vld [vmem:[#allocation8 + $0x158] sm:$0xff]  }
 0x12d   :  { %v265_v34 = vadd.f32 %v264_v29, %v102_v13  ;;  %v399_v38 = vmax.f32 %v304_v26, 0.0  ;;  %v308_v40 = vadd.f32 %v307_v35, %v110_v14  ;;  %v397_v41 = vmax.f32 %v261_v22, 0.0  ;;  %v1354_v23 = vld [vmem:[#allocation8 + $0x190] sm:$0xff]   ;;  %v1356_v26 = vld [vmem:[#allocation8 + $0x1d8] sm:$0xff]   ;;  %v1359_v29 = vld [vmem:[#allocation8 + $0x160] sm:$0xff]  }
 0x12e   :  { %v404_v39 = vmax.f32 %v263_v27, 0.0  ;;  %v406_v42 = vmax.f32 %v306_v33, 0.0  ;;  %v1357_v27 = vld [vmem:[#allocation8 + $0x118] sm:$0xff]   ;;  %v1363_v33 = vld [vmem:[#allocation8 + $0x168] sm:$0xff]  }
 0x12f   :  { %v405_v43 = vmax.f32 %v265_v34, 0.0  ;;  %v407_v46 = vmax.f32 %v308_v40, 0.0  ;;  %v1358_v28 = vld [vmem:[#allocation8 + $0x198] sm:$0xff]   ;;  %v1364_v34 = vld [vmem:[#allocation8 + $0x1e8] sm:$0xff]   ;;  %v1370_v40 = vld [vmem:[#allocation8 + $0x1b0] sm:$0xff]  }
 0x130   :  { %v412_v45 = vpack.c.bf16 %v404_v39, %v396_v37  ;;  %v414_v48 = vpack.c.bf16 %v406_v42, %v398_v32  ;;  %v1362_v32 = vld [vmem:[#allocation8 + $0x1a0] sm:$0xff]   ;;  %v1365_v35 = vld [vmem:[#allocation8 + $0x128] sm:$0xff]   ;;  %v1367_v37 = vld [vmem:[#allocation8 + $0x170] sm:$0xff]  }
 0x131   :  { %v413_v49 = vpack.c.bf16 %v405_v43, %v397_v41  ;;  %v344_v51 = vpop.f32.mrb[4].mxu0  ;;  %v415_v52 = vpack.c.bf16 %v407_v46, %v399_v38  ;;  %v387_v57 = vpop.f32.mrb[4].mxu1  ;;  %v1368_v38 = vld [vmem:[#allocation8 + $0x1f0] sm:$0xff]   ;;  %v1371_v41 = vld [vmem:[#allocation8 + $0x178] sm:$0xff]  }
 0x132   :  { %v345_v55 = vadd.f32 %v344_v51, %v114_v30  ;;  %v346_v56 = vpop.f32.mrb[5].mxu0  ;;  %v388_v61 = vadd.f32 %v387_v57, %v122_v44  ;;  %v389_v62 = vpop.f32.mrb[5].mxu1  ;;  %v1369_v39 = vld [vmem:[#allocation8 + $0x130] sm:$0xff]   ;;  %v1372_v42 = vld [vmem:[#allocation8 + $0x1f8] sm:$0xff]  }
 0x133   :  { %971 = vmatprep.mubr.bf16.mxu0 %v413_v49  ;;  %v347_v59 = vadd.f32 %v346_v56, %v118_v36  ;;  %v348_v60 = vpop.f32.mrb[6].mxu0  ;;  %1012 = vmatprep.mubr.bf16.mxu1 %v415_v52  ;;  %v390_v2 = vadd.f32 %v389_v62, %v126_v47  ;;  %v391_v3 = vpop.f32.mrb[6].mxu1  ;;  %v1373_v43 = vld [vmem:[#allocation8 + $0x138] sm:$0xff]  }
 0x134   :  { %972 = vmatmul.mubr.bf16.vlgmr.msra.gmra.mrb[8].mxu0 %v412_v45  ;;  %v400_v63 = vmax.f32 %v345_v55, 0.0  ;;  %v349_v0 = vadd.f32 %v348_v60, %v114_v30  ;;  %v350_v1 = vpop.f32.mrb[7].mxu0  ;;  %1013 = vmatmul.mubr.bf16.vlgmr.msra.gmra.mrb[8].mxu1 %v414_v48  ;;  %v402_v6 = vmax.f32 %v388_v61, 0.0  ;;  %v392_v8 = vadd.f32 %v391_v3, %v122_v44  ;;  %v393_v9 = vpop.f32.mrb[7].mxu1  ;;  %v1360_v30 = vld [vmem:[#allocation8 + $0x1e0] sm:$0xff]   ;;  %v1374_v44 = vld [vmem:[#allocation8 + $0x1b8] sm:$0xff]  }
 0x135   :  { %1255 = vmatpush3.bf16.msra.mxu0 %v1345_v50  ;;  %v401_v5 = vmax.f32 %v347_v59, 0.0  ;;  %v351_v7 = vadd.f32 %v350_v1, %v118_v36  ;;  %1277 = vmatpush3.bf16.msra.mxu1 %v1346_v53  ;;  %v403_v13 = vmax.f32 %v390_v2, 0.0  ;;  %v394_v14 = vadd.f32 %v393_v9, %v126_v47  ;;  %v1366_v36 = vld [vmem:[#allocation8 + $0x1a8] sm:$0xff]   ;;  %v1145_v47 = vld [vmem:[%s1619_s4] ss:$0 sm:$0xff]  ;;  %s1502_s4 = smov [#allocation10]  }
 0x136   :  { %1256 = vmatprep.subr.bf16.mxu0 %v1347_v54  ;;  %v408_v12 = vmax.f32 %v349_v0, 0.0  ;;  %1278 = vmatprep.subr.bf16.mxu1 %v1348_v58  ;;  %v410_v17 = vmax.f32 %v392_v8, 0.0  ;;  %s1110_s17 = sshll.u32 %s1502_s4, 4  ;;  %s1111_s17 = int_to_ptr.vmem [resolvable:$true] %s1110_s17 }
 0x137   :  { %v409_v16 = vmax.f32 %v351_v7, 0.0  ;;  %v411_v19 = vmax.f32 %v394_v14, 0.0  ;;  %s1463_s18 = scalar_lea.vmem %s1111_s17, 256  ;;  %p1468_p5 = scmp.lt.s32.totalorder %s1111_s17, %s1111_s17 }
 0x138   :  { %v416_v18 = vpack.c.bf16 %v408_v12, %v400_v63  ;;  %v418_v22 = vpack.c.bf16 %v410_v17, %v402_v6  ;;  %p1464_p4 = scmp.ne.s32.totalorder %s1111_s17, %s1463_s18  ;;  %p1469_p6 = scmp.lt.s32.totalorder %s1463_s18, %s1463_s18 }
 0x139   :  { %1257 = vmatpush3.bf16.msra.mxu0 %v1349_v4  ;;  %v417_v21 = vpack.c.bf16 %v409_v16, %v401_v5  ;;  %1279 = vmatpush3.bf16.msra.mxu1 %v1350_v10  ;;  %v419_v25 = vpack.c.bf16 %v411_v19, %v403_v13 }
 0x13a   :  { %1258 = vmatprep.subr.bf16.mxu0 %v1351_v11  ;;  %1280 = vmatprep.subr.bf16.mxu1 %v1352_v15  ;;  %p1470_p7 = por %p1469_p6, %p1468_p5 }
 0x13b   :  { %1053 = vmatprep.mubr.bf16.mxu0 %v417_v21  ;;  %1094 = vmatprep.mubr.bf16.mxu1 %v419_v25 }
 0x13c   :  { %p1471_p8 = pnand %p1470_p7, %p1464_p4 }
 0x13d   :  { %1259 = vmatpush3.bf16.msra.mxu0 %v1353_v20  ;;  %1281 = vmatpush3.bf16.msra.mxu1 %v1354_v23 }
 0x13e   :  { %1260 = vmatprep.subr.bf16.mxu0 %v1355_v24  ;;  %1282 = vmatprep.subr.bf16.mxu1 %v1356_v26 }
 0x141   :  { %1261 = vmatpush3.bf16.msra.mxu0 %v1357_v27  ;;  %1283 = vmatpush3.bf16.msra.mxu1 %v1358_v28 }
 0x142   :  { %1262 = vmatprep.subr.bf16.mxu0 %v1359_v29  ;;  %1284 = vmatprep.subr.bf16.mxu1 %v1360_v30 }
 0x145   :  { %1263 = vmatpush3.bf16.msra.mxu0 %v1361_v31  ;;  %1285 = vmatpush3.bf16.msra.mxu1 %v1362_v32 }
 0x146   :  { %1264 = vmatprep.subr.bf16.mxu0 %v1363_v33  ;;  %1286 = vmatprep.subr.bf16.mxu1 %v1364_v34 }
 0x149   :  { %1265 = vmatpush3.bf16.msra.mxu0 %v1365_v35  ;;  %1287 = vmatpush3.bf16.msra.mxu1 %v1366_v36 }
 0x14a   :  { %1266 = vmatprep.subr.bf16.mxu0 %v1367_v37  ;;  %1288 = vmatprep.subr.bf16.mxu1 %v1368_v38 }
 0x14d   :  { %1267 = vmatpush3.bf16.msra.mxu0 %v1369_v39  ;;  %1289 = vmatpush3.bf16.msra.mxu1 %v1370_v40 }
 0x14e   :  { %1268 = vmatprep.subr.bf16.mxu0 %v1371_v41  ;;  %1290 = vmatprep.subr.bf16.mxu1 %v1372_v42 }
 0x151   :  { %1269 = vmatpush3.bf16.msra.mxu0 %v1373_v43  ;;  %1291 = vmatpush3.bf16.msra.mxu1 %v1374_v44 }
 0x154   :  { %1054 = vmatmul.mubr.bf16.vlgmr.msra.gmra.mrb[12].mxu0 %v416_v18  ;;  %1095 = vmatmul.mubr.bf16.vlgmr.msra.gmra.mrb[12].mxu1 %v418_v22 }
 0x207   :  { %v1226_v45 = vpop.f32.mrb[8].mxu0  ;;  %v1248_v46 = vpop.f32.mrb[8].mxu1 }
 0x208   :  { %v1227_v48 = vpop.f32.mrb[9].mxu0  ;;  %v1249_v50 = vpop.f32.mrb[9].mxu1 }
 0x209   :  { %v1228_v49 = vadd.f32 %v1227_v48, %v1226_v45  ;;  %v1229_v51 = vpop.f32.mrb[10].mxu0  ;;  %v1250_v52 = vadd.f32 %v1249_v50, %v1248_v46  ;;  %v1251_v53 = vpop.f32.mrb[10].mxu1 }
 0x20a   :  { %v1230_v54 = vpop.f32.mrb[11].mxu0  ;;  %v1252_v57 = vpop.f32.mrb[11].mxu1 }
 0x20b   :  { %v974_v55 = vadd.f32 %v1228_v49, %v1145_v47  ;;  %v1231_v56 = vadd.f32 %v1230_v54, %v1229_v51  ;;  %v1253_v58 = vadd.f32 %v1252_v57, %v1251_v53 }
 0x20d   :  { %v1015_v59 = vadd.f32 %v1250_v52, %v974_v55  ;;  %v977_v60 = vadd.f32 %v1231_v56, %v1145_v47 }
 0x20f   :  { %v1018_v61 = vadd.f32 %v1253_v58, %v977_v60 }
 0x227   :  { %v1270_v62 = vpop.f32.mrb[12].mxu0  ;;  %v1292_v63 = vpop.f32.mrb[12].mxu1 }
 0x228   :  { %v1271_v0 = vpop.f32.mrb[13].mxu0  ;;  %v1293_v2 = vpop.f32.mrb[13].mxu1 }
 0x229   :  { %v1272_v1 = vadd.f32 %v1271_v0, %v1270_v62  ;;  %v1273_v3 = vpop.f32.mrb[14].mxu0  ;;  %v1294_v4 = vadd.f32 %v1293_v2, %v1292_v63  ;;  %v1295_v5 = vpop.f32.mrb[14].mxu1 }
 0x22a   :  { %v1274_v6 = vpop.f32.mrb[15].mxu0  ;;  %v1296_v9 = vpop.f32.mrb[15].mxu1 }
 0x22b   :  { %v1056_v7 = vadd.f32 %v1272_v1, %v1015_v59  ;;  %v1275_v8 = vadd.f32 %v1274_v6, %v1273_v3  ;;  %v1297_v10 = vadd.f32 %v1296_v9, %v1295_v5 }
 0x22d   :  { %v1097_v11 = vadd.f32 %v1294_v4, %v1056_v7  ;;  %v1059_v12 = vadd.f32 %v1275_v8, %v1018_v61 }
 0x22f   :  { %1103 = vst [vmem:[#allocation10] sm:$0xff] %v1097_v11  ;;  %v1100_v13 = vadd.f32 %v1297_v10, %v1059_v12 }
 0x231   :  { %1104 = vst [vmem:[#allocation10 + $0x8] sm:$0xff] %v1100_v13 }
 0x232   :  { %1474 = shalt.err (!%p1471_p8)
}
 0x233   :  { %s1475_s21 = scalar_lea.hbm %s1620_s5, 256 }
 0x234   :  { %p1476_p9 = scmp.ne.s32.totalorder %s1620_s5, %s1475_s21  ;;  %p1479_p10 = scmp.lt.u32.totalorder %s1475_s21, %s1620_s5 }
 0x236   :  { %p1481_p11 = pnand %p1479_p10, %p1476_p9 }
 0x238   :  { %1484 = shalt.err (!%p1481_p11)
}
 0x239   :  { %s1503_s26 = smov 128   ;;  %s1504_s27 = smov 8  }
 0x23a   :  { %1116 = dma.vmem_to_hbm [thread:$0]  %s1111_s17, 256, %s1620_s5, [#allocation4], %s1503_s26, %s1503_s26, %s1504_s27  }
 0x23b   :  { %1491 = dma.done.wait [#allocation4], 256  }
 0x23c   :  { %1492 = vsyncadd [#allocation4], 4294967040 }
 0x23d   :  { %1120 = vsyncpa [#allocation3], 1 }
 0x23e   :  { %1121 = vsyncpa [#allocation6], 1 }
 0x23f   :  { %1122 = vsyncpa [#allocation9], 1 }
 0x240   :  { %1123 = vsyncpa [#allocation4], 1 }

</bundles_post_ra>
